<compile_context>
chip_gen: v5e
topology: v5e:2x2
jax: 0.10.0
libtpu: 0.0.40
codegen_flags: <defaults>
</compile_context>

<pallas_src>
import math

import numpy as np
import jax
import jax.numpy as jnp
from jax.experimental import pallas as pl
from jax.experimental.pallas import tpu as pltpu

# ---- Wav2FFT configuration (lhotse defaults, scaled to small demo shapes) ----
SAMPLING_RATE = 8000
FRAME_LENGTH = 0.008          # seconds -> N_WIN = 64 samples / frame
FRAME_SHIFT = 0.004           # seconds -> SHIFT = 32 samples
PREEMPH_COEFF = 0.97
ENERGY_FLOOR = 1e-10          # lhotse EPSILON
ROUND_TO_POWER_OF_TWO = True

N_WIN = int(math.floor(FRAME_LENGTH * SAMPLING_RATE))    # 64
SHIFT = int(math.floor(FRAME_SHIFT * SAMPLING_RATE))     # 32
assert N_WIN == 2 * SHIFT, "gather-free framing below assumes 50% frame overlap"


def next_power_of_2(x: int) -> int:
    return 1 if x == 0 else 2 ** (x - 1).bit_length()


FFT_LENGTH = next_power_of_2(N_WIN) if ROUND_TO_POWER_OF_TWO else N_WIN  # 64
NUM_BINS = FFT_LENGTH // 2 + 1                                           # 33

IMAG_OFS = 64        # lane offset of the imaginary bins inside one 128-wide block
OUT_W = 128          # per-frame output width (lane-dense)
PACK = 2             # frames packed per LHS row
LHS_W = PACK * N_WIN         # 128
RHS_W = PACK * OUT_W         # 256
MAX_TILE_R = 1024    # packed rows per grid step (= 2048 frames; ~3 MB VMEM 2x-buf)

LOG_ENERGY_FLOOR = math.log(ENERGY_FLOOR)

assert IMAG_OFS >= NUM_BINS and IMAG_OFS + NUM_BINS <= OUT_W


# ------------------------- deterministic parameters -------------------------
def povey_window(n: int) -> np.ndarray:
    # hann(N, periodic=False) ** 0.85
    t = np.arange(n, dtype=np.float64)
    hann = 0.5 - 0.5 * np.cos(2.0 * np.pi * t / (n - 1))
    return hann ** 0.85


def fused_rdft_matrix() -> np.ndarray:
    """kron(I2, DCremove @ Preemph @ diag(povey) @ [cos | -sin]) -> (128, 256) f32."""
    # DC removal (subtract per-frame mean), as a right-multiplied matrix.
    c = np.eye(N_WIN, dtype=np.float64) - 1.0 / N_WIN
    # Pre-emphasis with replicate padding, right-multiplied:
    #   y[n] = x[n] - k * x[n-1]  (n >= 1),   y[0] = (1 - k) * x[0]
    a = np.eye(N_WIN, dtype=np.float64)
    a[0, 0] -= PREEMPH_COEFF
    for n in range(1, N_WIN):
        a[n - 1, n] -= PREEMPH_COEFF
    w = np.diag(povey_window(N_WIN))
    n = np.arange(N_WIN, dtype=np.float64)[:, None]
    k = np.arange(NUM_BINS, dtype=np.float64)[None, :]
    ang = 2.0 * np.pi * n * k / FFT_LENGTH
    d = np.zeros((N_WIN, OUT_W), dtype=np.float64)
    d[:, :NUM_BINS] = np.cos(ang)                        # rfft real part
    d[:, IMAG_OFS:IMAG_OFS + NUM_BINS] = -np.sin(ang)    # rfft imaginary part
    # Zero-padding of the frame to FFT_LENGTH is implicit (only N_WIN rows used).
    fused = c @ a @ w @ d                                # (64, 128)
    fused[:, 0] = 0.0   # real DC bin is overwritten by log-energy; don't compute it
    # Two frames per LHS row -> block-diagonal RHS.
    return np.kron(np.eye(2), fused).astype(np.float32)  # (128, 256)


# --------------------------------- kernel -----------------------------------
def wav2fft_kernel(x_ref, mh_ref, ml_ref, out_ref):
    x = x_ref[...]                               # (TILE_R, 128) f32, 2 frames / row

    # Raw log-energy per frame from raw moments (DC removal is folded into the RHS):
    #   sum((x - mu)^2) = sum(x^2) - (sum x)^2 / N
    def log_energy(v):
        s = jnp.sum(v, axis=-1, keepdims=True)
        q = jnp.sum(v * v, axis=-1, keepdims=True)
        e = jnp.maximum(q - s * s * jnp.float32(1.0 / N_WIN), 0.0)
        return jnp.maximum(jnp.log(e + 1e-15), jnp.float32(LOG_ENERGY_FLOOR))

    le_a = log_energy(x[:, :N_WIN])              # (TILE_R, 1)
    le_b = log_energy(x[:, N_WIN:])              # (TILE_R, 1)

    # DC removal + pre-emphasis + povey window + real DFT for BOTH packed frames in
    # one MXU matmul against the block-diagonal (128,256) RHS.  f32 accuracy via a
    # 3-pass bf16 split (only the lo*lo cross term is dropped, ~2^-16 rel error).
    xh = x.astype(jnp.bfloat16)
    xl = (x - xh.astype(jnp.float32)).astype(jnp.bfloat16)
    mh = mh_ref[...]
    ml = ml_ref[...]
    y = jnp.dot(xh, mh, preferred_element_type=jnp.float32)
    y = y + jnp.dot(xl, mh, preferred_element_type=jnp.float32)
    y = y + jnp.dot(xh, ml, preferred_element_type=jnp.float32)
    out_ref[...] = y

    # use_energy=True, raw_energy=True: real DC bin <- log-energy.  Two 1-wide
    # masked column stores (vst slot); the imaginary DC columns are exactly zero.
    out_ref[:, 0:1] = le_a
    out_ref[:, OUT_W:OUT_W + 1] = le_b


# ------------------------------ JAX glue ------------------------------------
def frame_waveform(x: jnp.ndarray) -> jnp.ndarray:
    """snip_edges=False Kaldi framing without an XLA gather (SHIFT | N_WIN)."""
    B, num_samples = x.shape
    num_frames = (num_samples + SHIFT // 2) // SHIFT
    new_num_samples = (num_frames - 1) * SHIFT + N_WIN     # == (num_frames+1)*SHIFT
    npad = new_num_samples - num_samples
    npad_left = (N_WIN - SHIFT) // 2
    npad_right = npad - npad_left
    pad_left = jnp.flip(x[:, :npad_left], axis=1)
    pad_right = jnp.flip(x[:, num_samples - npad_right:], axis=1)
    padded = jnp.concatenate([pad_left, x, pad_right], axis=1)
    blk = padded.reshape(B, num_frames + 1, SHIFT)
    # frame t = concat(blk[t], blk[t+1]) -> two contiguous slices, no gather
    return jnp.concatenate([blk[:, :-1, :], blk[:, 1:, :]], axis=-1)   # (B, T, 64)


def _round_up(v: int, m: int) -> int:
    return ((v + m - 1) // m) * m


def wav2fft(x: jnp.ndarray) -> jnp.ndarray:
    frames = frame_waveform(x.astype(jnp.float32))         # (B, T, N_WIN)
    B, T, _ = frames.shape
    m = B * T

    # 2 frames per packed row; packed rows must be a multiple of 8 (sublanes).
    m_pad = _round_up(max(m, PACK * 8), PACK * 8)
    rows = m_pad // PACK

    flat = frames.reshape(m, N_WIN)
    if m_pad != m:
        flat = jnp.pad(flat, ((0, m_pad - m), (0, 0)))
    packed = flat.reshape(rows, LHS_W)                      # free contiguous view

    mat = jnp.asarray(fused_rdft_matrix())                  # (128, 256) f32
    mh = mat.astype(jnp.bfloat16)
    ml = (mat - mh.astype(jnp.float32)).astype(jnp.bfloat16)

    # Large tiles amortise the ~0.35us per-step overhead, but keep >=2 grid steps
    # (when possible) so the "parallel" axis shards across both TCs on v7x.
    tile_r = min(MAX_TILE_R, max(8, _round_up((rows + 1) // 2, 8)))
    grid = ((rows + tile_r - 1) // tile_r,)

    out = pl.pallas_call(
        wav2fft_kernel,
        out_shape=jax.ShapeDtypeStruct((rows, RHS_W), jnp.float32),
        grid_spec=pltpu.PrefetchScalarGridSpec(
            num_scalar_prefetch=0,
            grid=grid,
            in_specs=[
                pl.BlockSpec((tile_r, LHS_W), lambda i: (i, 0)),    # packed frames
                pl.BlockSpec((LHS_W, RHS_W), lambda i: (0, 0)),     # RHS hi (bf16)
                pl.BlockSpec((LHS_W, RHS_W), lambda i: (0, 0)),     # RHS lo (bf16)
            ],
            out_specs=pl.BlockSpec((tile_r, RHS_W), lambda i: (i, 0)),
        ),
        compiler_params=pltpu.CompilerParams(
            dimension_semantics=("parallel",)),
    )(packed, mh, ml)

    # (rows, 256) -> (m_pad, 128) is a free contiguous view; then two aligned
    # slices split real/imag planes and drop the filler frames.
    plane = out.reshape(m_pad, OUT_W)
    real = plane[:m, :NUM_BINS]
    imag = plane[:m, IMAG_OFS:IMAG_OFS + NUM_BINS]
    X = jax.lax.complex(real, imag)                         # complex64
    return X.reshape(B, T, NUM_BINS)


# ------------------------------ reference -----------------------------------
def ref_wav2fft(x: jnp.ndarray) -> jnp.ndarray:
    frames = frame_waveform(x.astype(jnp.float32))
    mu = frames.mean(-1, keepdims=True)
    f = frames - mu
    log_e = jnp.log((f * f).sum(-1) + 1e-15)
    log_e = jnp.maximum(log_e, math.log(ENERGY_FLOOR))
    prev = jnp.concatenate([f[..., :1], f[..., :-1]], axis=-1)
    f = f - PREEMPH_COEFF * prev
    f = f * jnp.asarray(povey_window(N_WIN), dtype=jnp.float32)
    f = jnp.pad(f, ((0, 0), (0, 0), (0, FFT_LENGTH - N_WIN)))
    X = jnp.fft.rfft(f, axis=-1).astype(jnp.complex64)
    X = X.at[:, :, 0].set(log_e.astype(jnp.complex64))
    return X


# --------------------------------- main -------------------------------------
if __name__ == "__main__":
    key = jax.random.PRNGKey(0)
    B, S = 2, 400                                  # small waveform batch
    x = jax.random.normal(key, (B, S), dtype=jnp.float32)

    X = jax.block_until_ready(jax.jit(wav2fft)(x))
    X_ref = jax.block_until_ready(ref_wav2fft(x))

    assert X.shape == X_ref.shape and X.dtype == jnp.complex64, (X.shape, X.dtype)
    # 3-pass bf16 split carries ~2^-16 relative input precision; atol=3e-4 leaves
    # comfortable margin on near-zero bins while still validating full semantics.
    np.testing.assert_allclose(np.asarray(X), np.asarray(X_ref), rtol=2e-4, atol=3e-4)

    print("KERNEL_OK")
</pallas_src>

<mosaic_0001>
module attributes {stable_mosaic.version = 11 : i64} {
  func.func @wav2fft_kernel(%arg0: i32, %arg1: memref<8x128xf32, #tpu.memory_space<vmem>>, %arg2: memref<128x256xbf16, #tpu.memory_space<vmem>>, %arg3: memref<128x256xbf16, #tpu.memory_space<vmem>>, %arg4: memref<8x256xf32, #tpu.memory_space<vmem>>) attributes {dimension_semantics = [#tpu.dimension_semantics<parallel>], iteration_bounds = array<i64: 2>, scalar_prefetch = 0 : i64, scratch_operands = 0 : i64, tpu.core_type = #tpu.core_type<tc>, window_params = [{transform_indices = @transform_0, window_bounds = array<i64: 8, 128>}, {pipeline_mode = #tpu.pipeline_mode<synchronous>, transform_indices = @transform_1, window_bounds = array<i64: 128, 256>}, {pipeline_mode = #tpu.pipeline_mode<synchronous>, transform_indices = @transform_2, window_bounds = array<i64: 128, 256>}, {transform_indices = @transform_3, window_bounds = array<i64: 8, 256>}]} {
    %c0 = arith.constant 0 : index
    %c0_0 = arith.constant 0 : index
    %0 = vector.load %arg1[%c0, %c0_0] : memref<8x128xf32, #tpu.memory_space<vmem>>, vector<8x128xf32>
    %1 = vector.extract_strided_slice %0 {offsets = [0, 0], sizes = [8, 64], strides = [1, 1]} : vector<8x128xf32> to vector<8x64xf32>
    %cst = arith.constant dense<0.000000e+00> : vector<8xf32>
    %2 = vector.multi_reduction <add>, %1, %cst [1] : vector<8x64xf32> to vector<8xf32>
    %3 = vector.shape_cast %2 : vector<8xf32> to vector<8x1xf32>
    %4 = arith.mulf %1, %1 : vector<8x64xf32>
    %cst_1 = arith.constant dense<0.000000e+00> : vector<8xf32>
    %5 = vector.multi_reduction <add>, %4, %cst_1 [1] : vector<8x64xf32> to vector<8xf32>
    %6 = vector.shape_cast %5 : vector<8xf32> to vector<8x1xf32>
    %7 = arith.mulf %3, %3 : vector<8x1xf32>
    %cst_2 = arith.constant 1.562500e-02 : f32
    %8 = vector.broadcast %cst_2 : f32 to vector<8x1xf32>
    %9 = arith.mulf %7, %8 : vector<8x1xf32>
    %10 = arith.subf %6, %9 : vector<8x1xf32>
    %cst_3 = arith.constant 0.000000e+00 : f32
    %11 = vector.broadcast %cst_3 : f32 to vector<8x1xf32>
    %12 = arith.maximumf %10, %11 : vector<8x1xf32>
    %cst_4 = arith.constant 1.000000e-15 : f32
    %13 = vector.broadcast %cst_4 : f32 to vector<8x1xf32>
    %14 = arith.addf %12, %13 : vector<8x1xf32>
    %15 = math.log %14 : vector<8x1xf32>
    %cst_5 = arith.constant -23.0258503 : f32
    %16 = vector.broadcast %cst_5 : f32 to vector<8x1xf32>
    %17 = arith.maximumf %15, %16 : vector<8x1xf32>
    %18 = vector.extract_strided_slice %0 {offsets = [0, 64], sizes = [8, 64], strides = [1, 1]} : vector<8x128xf32> to vector<8x64xf32>
    %cst_6 = arith.constant dense<0.000000e+00> : vector<8xf32>
    %19 = vector.multi_reduction <add>, %18, %cst_6 [1] : vector<8x64xf32> to vector<8xf32>
    %20 = vector.shape_cast %19 : vector<8xf32> to vector<8x1xf32>
    %21 = arith.mulf %18, %18 : vector<8x64xf32>
    %cst_7 = arith.constant dense<0.000000e+00> : vector<8xf32>
    %22 = vector.multi_reduction <add>, %21, %cst_7 [1] : vector<8x64xf32> to vector<8xf32>
    %23 = vector.shape_cast %22 : vector<8xf32> to vector<8x1xf32>
    %24 = arith.mulf %20, %20 : vector<8x1xf32>
    %cst_8 = arith.constant 1.562500e-02 : f32
    %25 = vector.broadcast %cst_8 : f32 to vector<8x1xf32>
    %26 = arith.mulf %24, %25 : vector<8x1xf32>
    %27 = arith.subf %23, %26 : vector<8x1xf32>
    %cst_9 = arith.constant 0.000000e+00 : f32
    %28 = vector.broadcast %cst_9 : f32 to vector<8x1xf32>
    %29 = arith.maximumf %27, %28 : vector<8x1xf32>
    %cst_10 = arith.constant 1.000000e-15 : f32
    %30 = vector.broadcast %cst_10 : f32 to vector<8x1xf32>
    %31 = arith.addf %29, %30 : vector<8x1xf32>
    %32 = math.log %31 : vector<8x1xf32>
    %cst_11 = arith.constant -23.0258503 : f32
    %33 = vector.broadcast %cst_11 : f32 to vector<8x1xf32>
    %34 = arith.maximumf %32, %33 : vector<8x1xf32>
    %35 = arith.truncf %0 : vector<8x128xf32> to vector<8x128xbf16>
    %36 = arith.extf %35 : vector<8x128xbf16> to vector<8x128xf32>
    %37 = arith.subf %0, %36 : vector<8x128xf32>
    %38 = arith.truncf %37 : vector<8x128xf32> to vector<8x128xbf16>
    %c0_12 = arith.constant 0 : index
    %c0_13 = arith.constant 0 : index
    %39 = vector.load %arg2[%c0_12, %c0_13] : memref<128x256xbf16, #tpu.memory_space<vmem>>, vector<128x256xbf16>
    %c0_14 = arith.constant 0 : index
    %c0_15 = arith.constant 0 : index
    %40 = vector.load %arg3[%c0_14, %c0_15] : memref<128x256xbf16, #tpu.memory_space<vmem>>, vector<128x256xbf16>
    %cst_16 = arith.constant dense<0.000000e+00> : vector<8x256xf32>
    %41 = tpu.matmul %35, %39, %cst_16 {dimension_numbers = #tpu.dot_dimension_numbers<[1], [0], [0], [1], [0, 0, 1, 1], [], []>} : vector<8x128xbf16>, vector<128x256xbf16>, vector<8x256xf32> -> vector<8x256xf32>
    %cst_17 = arith.constant dense<0.000000e+00> : vector<8x256xf32>
    %42 = tpu.matmul %38, %39, %cst_17 {dimension_numbers = #tpu.dot_dimension_numbers<[1], [0], [0], [1], [0, 0, 1, 1], [], []>} : vector<8x128xbf16>, vector<128x256xbf16>, vector<8x256xf32> -> vector<8x256xf32>
    %43 = arith.addf %41, %42 : vector<8x256xf32>
    %cst_18 = arith.constant dense<0.000000e+00> : vector<8x256xf32>
    %44 = tpu.matmul %35, %40, %cst_18 {dimension_numbers = #tpu.dot_dimension_numbers<[1], [0], [0], [1], [0, 0, 1, 1], [], []>} : vector<8x128xbf16>, vector<128x256xbf16>, vector<8x256xf32> -> vector<8x256xf32>
    %45 = arith.addf %43, %44 : vector<8x256xf32>
    %c0_19 = arith.constant 0 : index
    %c0_20 = arith.constant 0 : index
    %46 = vector.load %arg4[%c0_19, %c0_20] : memref<8x256xf32, #tpu.memory_space<vmem>>, vector<8x256xf32>
    tpu.vector_store %arg4[%c0_19, %c0_20], %45 {strides = array<i32>} : memref<8x256xf32, #tpu.memory_space<vmem>>, vector<8x256xf32>,
    %c0_21 = arith.constant 0 : index
    %c0_22 = arith.constant 0 : index
    %47 = vector.load %arg4[%c0_21, %c0_22] : memref<8x256xf32, #tpu.memory_space<vmem>>, vector<8x1xf32>
    tpu.vector_store %arg4[%c0_21, %c0_22], %17 {strides = array<i32>} : memref<8x256xf32, #tpu.memory_space<vmem>>, vector<8x1xf32>,
    %c0_23 = arith.constant 0 : index
    %c128 = arith.constant 128 : index
    %48 = vector.load %arg4[%c0_23, %c128] : memref<8x256xf32, #tpu.memory_space<vmem>>, vector<8x1xf32>
    tpu.vector_store %arg4[%c0_23, %c128], %34 {strides = array<i32>} : memref<8x256xf32, #tpu.memory_space<vmem>>, vector<8x1xf32>,
    return
  }
  func.func @transform_0(%arg0: i32) -> (i32, i32) {
    %c0_i32 = arith.constant 0 : i32
    %c0_i32_0 = arith.constant 0 : i32
    return %arg0, %c0_i32 : i32, i32
  }
  func.func @transform_1(%arg0: i32) -> (i32, i32) {
    %c0_i32 = arith.constant 0 : i32
    %c0_i32_0 = arith.constant 0 : i32
    %c0_i32_1 = arith.constant 0 : i32
    return %c0_i32, %c0_i32_0 : i32, i32
  }
  func.func @transform_2(%arg0: i32) -> (i32, i32) {
    %c0_i32 = arith.constant 0 : i32
    %c0_i32_0 = arith.constant 0 : i32
    %c0_i32_1 = arith.constant 0 : i32
    return %c0_i32, %c0_i32_0 : i32, i32
  }
  func.func @transform_3(%arg0: i32) -> (i32, i32) {
    %c0_i32 = arith.constant 0 : i32
    %c0_i32_0 = arith.constant 0 : i32
    return %arg0, %c0_i32 : i32, i32
  }
}

</mosaic_0001>

<bundles_post_ra>
// kernel: custom-call
= control target key start
LH: loop header
LB: loop body
LE: loop exit
PB: predicated region body
PF: predicated region fallthrough
CT: control target
= control target key end

     0   :  { %s111_s0 = inlined_call_operand.vmem [shape: f32[2,13,33], index: 0, kind: input, shape index: {}]   ;;  %s112_s1 = inlined_call_operand.vmem [shape: f32[2,13,33], index: 1, kind: input, shape index: {}]   ;;  %s113_s2 = inlined_call_operand.vmem [shape: c64[2,13,33], index: 2, kind: output, shape index: {}]  }
   0x1   :  { %v4_v0 = vld [vmem:[%s111_s0] sm:$0xff]  ;;  %v35_v1 = vld [vmem:[%s111_s0 + $0x8] sm:$0xff]  ;;  %v37_v2 = vld [vmem:[%s111_s0 + $0x10] sm:$0xff] }
   0x2   :  { %5 = vst [vmem:[%s113_s2] sm:$0xff] %v4_v0  ;;  %v39_v3 = vld [vmem:[%s111_s0 + $0x18] sm:$0xff]  ;;  %v18_v4 = vld [vmem:[%s112_s1] sm:$0xff]  ;;  %v42_v5 = vld [vmem:[%s112_s1 + $0x8] sm:$0xff] }
   0x3   :  { %36 = vst [vmem:[%s113_s2 + $0x8] sm:$0xff] %v35_v1  ;;  %v44_v6 = vld [vmem:[%s112_s1 + $0x10] sm:$0xff]  ;;  %v46_v7 = vld [vmem:[%s112_s1 + $0x18] sm:$0xff] }
   0x4   :  { %38 = vst [vmem:[%s113_s2 + $0x10] sm:$0xff] %v37_v2 }
   0x5   :  { %40 = vst [vmem:[%s113_s2 + $0x18] sm:$0xff] %v39_v3 }
   0x6   :  { %41 = vst [vmem:[%s113_s2 + $0x20] sm:$0xff] %v18_v4 }
   0x7   :  { %43 = vst [vmem:[%s113_s2 + $0x28] sm:$0xff] %v42_v5 }
   0x8   :  { %45 = vst [vmem:[%s113_s2 + $0x30] sm:$0xff] %v44_v6 }
   0x9   :  { %47 = vst [vmem:[%s113_s2 + $0x38] sm:$0xff] %v46_v7 }

// kernel: wav2fft.1
= control target key start
LH: loop header
LB: loop body
LE: loop exit
PB: predicated region body
PF: predicated region fallthrough
CT: control target
= control target key end

     0   :  { %s756_s12 = smov 0   ;;  %s993_s0 = inlined_call_operand.vmem [shape: f32[16,128], index: 0, kind: input, shape index: {}]   ;;  %s994_s1 = inlined_call_operand.vmem [shape: bf16[128,256], index: 1, kind: input, shape index: {}]   ;;  %s995_s2 = inlined_call_operand.vmem [shape: bf16[128,256], index: 2, kind: input, shape index: {}]   ;;  %s996_s3 = inlined_call_operand.vmem [shape: f32[16,256], index: 3, kind: output, shape index: {}]  }
   0x1 LB: > { %s543_s13 = sadd.s32 4294967295, %s733_s12   ;;  %p547_p0 = scmp.ge.s32.totalorder %s733_s12, 1  ;;  %s733_s12 = sphi %s756_s12, %s13_s12  }
   0x2   : > { %p136_p1 = scmp.lt.s32.totalorder %s733_s12, 3 }
   0x4   : > { %p137_p2 = pnand %p547_p0, %p136_p1 }
   0x5   : > { %p159_p3 = scmp.lt.s32.totalorder (!%p137_p2), %s543_s13, 1  ;;  %s735_s17 = smov (!%p137_p2), 64  }
   0x6   : > { %140 = sbr.rel (%p137_p2) target bundleno = 275 (0x113), region = 32 }
   0xb   : > { %v609_v0 = vld [vmem:[%s994_s1 + $0x70] sm:$0xf]  ;;  %v697_v1 = vld [vmem:[%s994_s1 + $0x74] sm:$0xf0]  ;;  %v696_v3 = vld [vmem:[%s994_s1 + $0x74] sm:$0xf] }
   0xc   : > { %v610_v2 = vor.u32 %v697_v1, %v609_v0  ;;  %v611_v4 = vld [vmem:[%s994_s1 + $0x78] sm:$0xf0]  ;;  %v601_v5 = vld [vmem:[%s994_s1 + $0x60] sm:$0xf]  ;;  %s998_s13 = smov (!%p159_p3, %s543_s13), 1  ;;  %vm169_vm0 = vcmask 523264  }
   0xd   : > { %v614_v6 = vor.u32 %v696_v3, %v611_v4  ;;  %v695_v7 = vld [vmem:[%s994_s1 + $0x64] sm:$0xf0]  ;;  %v694_v8 = vld [vmem:[%s994_s1 + $0x64] sm:$0xf]  ;;  %v603_v10 = vld [vmem:[%s994_s1 + $0x68] sm:$0xf0] }
   0xe   : > { %323 = vmatpush.bf16.msra.mxu0 %v610_v2  ;;  %v602_v9 = vor.u32 %v695_v7, %v601_v5  ;;  %349 = vmatpush.bf16.msra.mxu2 %v610_v2  ;;  %s548_s30 = sshll.u32 %s998_s13, 3  ;;  %v606_v11 = vor.u32 %v694_v8, %v603_v10  ;;  %v593_v12 = vld [vmem:[%s994_s1 + $0x50] sm:$0xf]  ;;  %v693_v13 = vld [vmem:[%s994_s1 + $0x54] sm:$0xf0]  ;;  %s681_s22 = sshll.u32 %s998_s13, 4 }
   0xf   : > { %336 = vmatpush.bf16.msra.mxu1 %v614_v6  ;;  %362 = vmatpush.bf16.msra.mxu3 %v614_v6  ;;  %s162_s10 = scalar_lea.vmem %s993_s0, %s548_s30  ;;  %v692_v14 = vld [vmem:[%s994_s1 + $0x54] sm:$0xf]  ;;  %v595_v15 = vld [vmem:[%s994_s1 + $0x58] sm:$0xf0]  ;;  %v594_v17 = vor.u32 %v693_v13, %v593_v12  ;;  %v585_v19 = vld [vmem:[%s994_s1 + $0x40] sm:$0xf]  ;;  %s167_s25 = scalar_lea.vmem %s996_s3, %s681_s22 }
  0x10   : > { %v806_v16 = vld [vmem:[%s162_s10] sm:$0xff]  ;;  %v598_v18 = vor.u32 %v692_v14, %v595_v15  ;;  %v691_v20 = vld [vmem:[%s994_s1 + $0x44] sm:$0xf0]  ;;  %v587_v22 = vld [vmem:[%s994_s1 + $0x48] sm:$0xf0]  ;;  %vm485_vm1 = vcmask 7168  }
  0x11   : > { %186 = vrot.lane.b32.xlu0 %v806_v16, %s735_s17  ;;  %v690_v21 = vld [vmem:[%s994_s1 + $0x44] sm:$0xf]  ;;  %v823_v23 = vmul.f32 %v806_v16, %v806_v16  ;;  %v586_v24 = vor.u32 %v691_v20, %v585_v19  ;;  %v577_v26 = vld [vmem:[%s994_s1 + $0x30] sm:$0xf]  ;;  %v689_v27 = vld [vmem:[%s994_s1 + $0x34] sm:$0xf0]  ;;  %v852_v36 = vpack.c.bf16 %v806_v16, %v806_v16 }
  0x12   : > { %324 = vmatpush.bf16.msra.mxu0 %v602_v9  ;;  %350 = vmatpush.bf16.msra.mxu2 %v602_v9  ;;  %v590_v25 = vor.u32 %v690_v21, %v587_v22  ;;  %v688_v28 = vld [vmem:[%s994_s1 + $0x34] sm:$0xf]  ;;  %v579_v29 = vld [vmem:[%s994_s1 + $0x38] sm:$0xf0]  ;;  %v578_v30 = vor.u32 %v689_v27, %v577_v26  ;;  %v569_v32 = vld [vmem:[%s994_s1 + $0x20] sm:$0xf] }
  0x13   : > { %337 = vmatpush.bf16.msra.mxu1 %v606_v11  ;;  %363 = vmatpush.bf16.msra.mxu3 %v606_v11  ;;  %v582_v31 = vor.u32 %v688_v28, %v579_v29  ;;  %v687_v33 = vld [vmem:[%s994_s1 + $0x24] sm:$0xf0]  ;;  %v686_v34 = vld [vmem:[%s994_s1 + $0x24] sm:$0xf]  ;;  %v571_v35 = vld [vmem:[%s994_s1 + $0x28] sm:$0xf0]  ;;  %v208_v43 = vunpack.c.l.bf16 %v852_v36 }
  0x14   : > { %v570_v37 = vor.u32 %v687_v33, %v569_v32  ;;  %v574_v38 = vor.u32 %v686_v34, %v571_v35  ;;  %v561_v39 = vld [vmem:[%s994_s1 + $0x10] sm:$0xf]  ;;  %v685_v40 = vld [vmem:[%s994_s1 + $0x14] sm:$0xf0]  ;;  %v684_v41 = vld [vmem:[%s994_s1 + $0x14] sm:$0xf] }
  0x15   : > { %v563_v42 = vld [vmem:[%s994_s1 + $0x18] sm:$0xf0]  ;;  %v562_v44 = vor.u32 %v685_v40, %v561_v39  ;;  %v553_v46 = vld [vmem:[%s994_s1] sm:$0xf]  ;;  %v683_v47 = vld [vmem:[%s994_s1 + $0x4] sm:$0xf0]  ;;  %v209_v54 = vsub.f32 %v806_v16, %v208_v43 }
  0x16   : > { %325 = vmatpush.bf16.msra.mxu0 %v594_v17  ;;  %351 = vmatpush.bf16.msra.mxu2 %v594_v17  ;;  %v566_v45 = vor.u32 %v684_v41, %v563_v42  ;;  %v682_v48 = vld [vmem:[%s994_s1 + $0x4] sm:$0xf]  ;;  %v555_v49 = vld [vmem:[%s994_s1 + $0x8] sm:$0xf0]  ;;  %v673_v50 = vld [vmem:[%s995_s2 + $0x70] sm:$0xf]  ;;  %v554_v55 = vor.u32 %v683_v47, %v553_v46 }
  0x17   : > { %338 = vmatpush.bf16.msra.mxu1 %v598_v18  ;;  %364 = vmatpush.bf16.msra.mxu3 %v598_v18  ;;  %v713_v51 = vld [vmem:[%s995_s2 + $0x74] sm:$0xf0]  ;;  %v712_v52 = vld [vmem:[%s995_s2 + $0x74] sm:$0xf]  ;;  %v675_v53 = vld [vmem:[%s995_s2 + $0x78] sm:$0xf0]  ;;  %v558_v56 = vor.u32 %v682_v48, %v555_v49  ;;  %v210_v63 = vpack.c.bf16 %v209_v54, %v209_v54 }
  0x18   : > { %v674_v57 = vor.u32 %v713_v51, %v673_v50  ;;  %v678_v58 = vor.u32 %v712_v52, %v675_v53  ;;  %v665_v59 = vld [vmem:[%s995_s2 + $0x60] sm:$0xf]  ;;  %v711_v60 = vld [vmem:[%s995_s2 + $0x64] sm:$0xf0]  ;;  %v710_v61 = vld [vmem:[%s995_s2 + $0x64] sm:$0xf] }
  0x19   : > { %193 = vrot.lane.b32.xlu0 %v823_v23, %s735_s17  ;;  %v667_v62 = vld [vmem:[%s995_s2 + $0x68] sm:$0xf0]  ;;  %v170_v0 = vsel %vm169_vm0, %v806_v16, 0.0  ;;  %v666_v1 = vor.u32 %v711_v60, %v665_v59  ;;  %v657_v3 = vld [vmem:[%s995_s2 + $0x50] sm:$0xf]  ;;  %v174_v41 = vsel %vm169_vm0, %v823_v23, 0.0 }
  0x1a   : > { %326 = vmatpush.bf16.msra.mxu0 %v586_v24  ;;  %352 = vmatpush.bf16.msra.mxu2 %v586_v24  ;;  %v670_v2 = vor.u32 %v710_v61, %v667_v62  ;;  %v709_v4 = vld [vmem:[%s995_s2 + $0x54] sm:$0xf0]  ;;  %v708_v5 = vld [vmem:[%s995_s2 + $0x54] sm:$0xf]  ;;  %v659_v6 = vld [vmem:[%s995_s2 + $0x58] sm:$0xf0] }
  0x1b   : > { %339 = vmatpush.bf16.msra.mxu1 %v590_v25  ;;  %365 = vmatpush.bf16.msra.mxu3 %v590_v25  ;;  %v658_v7 = vor.u32 %v709_v4, %v657_v3  ;;  %v662_v8 = vor.u32 %v708_v5, %v659_v6  ;;  %v649_v9 = vld [vmem:[%s995_s2 + $0x40] sm:$0xf]  ;;  %v707_v10 = vld [vmem:[%s995_s2 + $0x44] sm:$0xf0]  ;;  %v706_v11 = vld [vmem:[%s995_s2 + $0x44] sm:$0xf] }
  0x1c   : > { %171 = vadd.xlane.f32.xlu1 %v170_v0  ;;  %v651_v12 = vld [vmem:[%s995_s2 + $0x48] sm:$0xf0]  ;;  %v650_v13 = vor.u32 %v707_v10, %v649_v9  ;;  %v641_v15 = vld [vmem:[%s995_s2 + $0x30] sm:$0xf]  ;;  %v705_v16 = vld [vmem:[%s995_s2 + $0x34] sm:$0xf0]  ;;  %175 = vadd.xlane.f32.xlu2 %v174_v41 }
  0x1d   : > { %v654_v14 = vor.u32 %v706_v11, %v651_v12  ;;  %v704_v17 = vld [vmem:[%s995_s2 + $0x34] sm:$0xf]  ;;  %v643_v18 = vld [vmem:[%s995_s2 + $0x38] sm:$0xf0]  ;;  %v642_v19 = vor.u32 %v705_v16, %v641_v15  ;;  %v633_v21 = vld [vmem:[%s995_s2 + $0x20] sm:$0xf] }
  0x1e   : > { %327 = vmatpush.bf16.msra.mxu0 %v578_v30  ;;  %353 = vmatpush.bf16.msra.mxu2 %v578_v30  ;;  %v646_v20 = vor.u32 %v704_v17, %v643_v18  ;;  %v703_v22 = vld [vmem:[%s995_s2 + $0x24] sm:$0xf0]  ;;  %v702_v24 = vld [vmem:[%s995_s2 + $0x24] sm:$0xf]  ;;  %v635_v25 = vld [vmem:[%s995_s2 + $0x28] sm:$0xf0] }
  0x1f   : > { %340 = vmatpush.bf16.msra.mxu1 %v582_v31  ;;  %366 = vmatpush.bf16.msra.mxu3 %v582_v31  ;;  %v634_v26 = vor.u32 %v703_v22, %v633_v21  ;;  %v638_v27 = vor.u32 %v702_v24, %v635_v25  ;;  %v625_v28 = vld [vmem:[%s995_s2 + $0x10] sm:$0xf]  ;;  %v701_v29 = vld [vmem:[%s995_s2 + $0x14] sm:$0xf0]  ;;  %v700_v30 = vld [vmem:[%s995_s2 + $0x14] sm:$0xf] }
  0x20   : > { %v627_v31 = vld [vmem:[%s995_s2 + $0x18] sm:$0xf0]  ;;  %v626_v32 = vor.u32 %v701_v29, %v625_v28  ;;  %v617_v34 = vld [vmem:[%s995_s2] sm:$0xf]  ;;  %v699_v35 = vld [vmem:[%s995_s2 + $0x4] sm:$0xf0] }
  0x21   : > { %v630_v33 = vor.u32 %v700_v30, %v627_v31  ;;  %v618_v39 = vor.u32 %v699_v35, %v617_v34 }
  0x22   : > { %328 = vmatpush.bf16.msra.mxu0 %v570_v37  ;;  %354 = vmatpush.bf16.msra.mxu2 %v570_v37  ;;  %v698_v37 = vld [vmem:[%s995_s2 + $0x4] sm:$0xf] }
  0x23   : > { %341 = vmatpush.bf16.msra.mxu1 %v574_v38  ;;  %367 = vmatpush.bf16.msra.mxu3 %v574_v38  ;;  %v619_v38 = vld [vmem:[%s995_s2 + $0x8] sm:$0xf0] }
  0x24   : > { %v622_v40 = vor.u32 %v698_v37, %v619_v38 }
  0x26   : > { %329 = vmatpush.bf16.msra.mxu0 %v562_v44  ;;  %355 = vmatpush.bf16.msra.mxu2 %v562_v44 }
  0x27   : > { %342 = vmatpush.bf16.msra.mxu1 %v566_v45  ;;  %368 = vmatpush.bf16.msra.mxu3 %v566_v45 }
  0x2a   : > { %330 = vmatpush.bf16.msra.mxu0 %v554_v55  ;;  %356 = vmatpush.bf16.msra.mxu2 %v554_v55 }
  0x2b   : > { %343 = vmatpush.bf16.msra.mxu1 %v558_v56  ;;  %369 = vmatpush.bf16.msra.mxu3 %v558_v56 }
  0x2d   : > { %331 = vmatmul.bf16.vlgmr.msra.gmra.mxu0 %v210_v63  ;;  %357 = vmatmul.bf16.vlgmr.msra.gmra.mxu2 %v852_v36 }
  0x2e   : > { %455 = vmatpush.bf16.msrb.mxu0 %v674_v57  ;;  %344 = vmatmul.bf16.vlgmr.msra.gmra.mxu1 %v210_v63 }
  0x2f   : > { %468 = vmatpush.bf16.msrb.mxu1 %v678_v58  ;;  %370 = vmatmul.bf16.vlgmr.msra.gmra.mxu3 %v852_v36 }
  0x32   : > { %456 = vmatpush.bf16.msrb.mxu0 %v666_v1 }
  0x33   : > { %469 = vmatpush.bf16.msrb.mxu1 %v670_v2 }
  0x36   : > { %457 = vmatpush.bf16.msrb.mxu0 %v658_v7 }
  0x37   : > { %470 = vmatpush.bf16.msrb.mxu1 %v662_v8 }
  0x3a   : > { %458 = vmatpush.bf16.msrb.mxu0 %v650_v13 }
  0x3b   : > { %471 = vmatpush.bf16.msrb.mxu1 %v654_v14 }
  0x3e   : > { %459 = vmatpush.bf16.msrb.mxu0 %v642_v19 }
  0x3f   : > { %472 = vmatpush.bf16.msrb.mxu1 %v646_v20 }
  0x42   : > { %460 = vmatpush.bf16.msrb.mxu0 %v634_v26 }
  0x43   : > { %473 = vmatpush.bf16.msrb.mxu1 %v638_v27 }
  0x46   : > { %461 = vmatpush.bf16.msrb.mxu0 %v626_v32 }
  0x47   : > { %474 = vmatpush.bf16.msrb.mxu1 %v630_v33 }
  0x4a   : > { %462 = vmatpush.bf16.msrb.mxu0 %v618_v39 }
  0x4b   : > { %475 = vmatpush.bf16.msrb.mxu1 %v622_v40 }
  0x4d   : > { %463 = vmatmul.bf16.vlgmr.msrb.gmra.mxu0 %v852_v36 }
  0x4e   : > { %476 = vmatmul.bf16.vlgmr.msrb.gmra.mxu1 %v852_v36 }
  0x83   : > { %v187_v42 = vpop.permute.xlu0 %186 }
  0x84   : > { %v189_v43 = vsel %vm169_vm0, %v187_v42, 0.0 }
  0x85   : > { %190 = vadd.xlane.f32.xlu1 %v189_v43 }
  0x8b   : > { %v194_v44 = vpop.permute.xlu0 %193 }
  0x8c   : > { %v196_v45 = vsel %vm169_vm0, %v194_v44, 0.0 }
  0x8d   : > { %197 = vadd.xlane.f32.xlu2 %v196_v45 }
  0x8f   : > { %v172_v50 = vpop.xlane.xlu1 %171  ;;  %v176_v52 = vpop.xlane.xlu2 %175 }
  0x90   : > { %v177_v51 = vmul.f32 %v172_v50, %v172_v50 }
  0x92   : > { %v178_v36 = vmul.f32 0.015625, %v177_v51 }
  0x94   : > { %v179_v53 = vsub.f32 %v176_v52, %v178_v36 }
  0x96   : > { %v180_v23 = vmax.f32 %v179_v53, 0.0 }
  0x98   : > { %v181_v60 = vadd.f32 1e-15, %v180_v23 }
  0x9a   : > { %723 = vlog2.f32 %v181_v60 }
  0xa0   : > { %v724_v3 = vpop.eup %723 }
  0xa1   : > { %v183_v4 = vmul.f32 0.6931472, %v724_v3 }
  0xa3   : > { %v184_v5 = vmax.f32 %v183_v4, -23.02585 }
  0xaa   : > { %v332_v46 = vpop.f32.mrf.mxu0 }
  0xab   : > { %v345_v47 = vpop.f32.mrf.mxu1 }
  0xb0   : > { %v358_v54 = vpop.f32.mrf.mxu2 }
  0xb1   : > { %v359_v56 = vadd.f32 %v358_v54, %v332_v46 }
  0xb2   : > { %v334_v48 = vpop.f32.mrf.mxu0  ;;  %v371_v55 = vpop.f32.mrf.mxu3 }
  0xb3   : > { %v347_v49 = vpop.f32.mrf.mxu1  ;;  %v372_v57 = vadd.f32 %v371_v55, %v345_v47 }
  0xb8   : > { %v360_v63 = vpop.f32.mrf.mxu2 }
  0xba   : > { %v373_v0 = vpop.f32.mrf.mxu3 }
  0xca   : > { %v464_v58 = vpop.f32.mrf.mxu0 }
  0xcb   : > { %v477_v59 = vpop.f32.mrf.mxu1  ;;  %v481_v61 = vadd.f32 %v464_v58, %v359_v56 }
  0xcc   : > { %v482_v62 = vadd.f32 %v477_v59, %v372_v57 }
  0xcd   : > { %483 = vst [vmem:[%s167_s25] sm:$0xff] %v481_v61 }
  0xce   : > { %484 = vst [vmem:[%s167_s25 + $0x8] sm:$0xff] %v482_v62 }
  0xcf   : > { %486 = vst.msk [vmem:[%s167_s25] sm:$0xff] %vm485_vm1, %v184_v5 }
  0xd2   : > { %v466_v1 = vpop.f32.mrf.mxu0 }
  0xd3   : > { %v479_v2 = vpop.f32.mrf.mxu1 }
  0xf8   : > { %v191_v6 = vpop.xlane.xlu1 %190 }
  0xf9   : > { %v199_v7 = vmul.f32 %v191_v6, %v191_v6 }
  0xfb   : > { %v200_v8 = vmul.f32 0.015625, %v199_v7 }
 0x100   : > { %v198_v9 = vpop.xlane.xlu2 %197 }
 0x101   : > { %v201_v10 = vsub.f32 %v198_v9, %v200_v8 }
 0x103   : > { %v202_v11 = vmax.f32 %v201_v10, 0.0 }
 0x105   : > { %v203_v12 = vadd.f32 1e-15, %v202_v11 }
 0x107   : > { %725 = vlog2.f32 %v203_v12 }
 0x10d   : > { %v726_v13 = vpop.eup %725 }
 0x10e   : > { %v205_v14 = vmul.f32 0.6931472, %v726_v13 }
 0x110   : > { %v206_v15 = vmax.f32 %v205_v14, -23.02585 }
 0x112   : > { %487 = vst.msk [vmem:[%s167_s25 + $0x8] sm:$0xff] %vm485_vm1, %v206_v15 }
 0x113 PF: > { %s13_s12 = sadd.s32 1, %s733_s12  }
 0x114   : > { %p10_p4 = scmp.ge.s32.totalorder %s13_s12, 4  }
 0x116   :  { %12 = sbr.rel (!%p10_p4) target bundleno = 1 (0x1), region = 62 }

</bundles_post_ra>
